<compile_context>
chip_gen: v6e
topology: v6e:2x2x1
jax: 0.10.0
libtpu: 0.0.40
codegen_flags: <defaults>
</compile_context>

<pallas_src>
import jax
import jax.numpy as jnp
from jax.experimental import pallas as pl
from jax.experimental.pallas import tpu as pltpu
from functools import partial

_LANES = 128
_SUBLANES = 8
_TARGET_BLOCK_BYTES = 4 * 1024 * 1024  # ~4 MiB per block; 2(in)+2(out) bufs ~16 MiB live


def _scale_kernel(x_ref, o_ref, *, scale):
    # single VPU multiply per vreg; kernel is HBM-bandwidth bound on all generations
    o_ref[...] = x_ref[...] * jnp.asarray(scale, x_ref.dtype)


def _choose_cols(n):
    # widest lane-dense last dim (multiple of 128) such that at least one full
    # (8, cols) tile exists; keeps stores unmasked and DMA descriptors long.
    for c in (4096, 2048, 1024, 512, 256, 128):
        if n >= c * _SUBLANES:
            return c
    return _LANES


def _to_padded_2d(x):
    """Flatten to a lane-dense (rows, cols) slab with rows % 8 == 0, cols % 128 == 0."""
    flat = jnp.ravel(x)
    n = flat.size
    cols = _choose_cols(n)
    align = cols * _SUBLANES
    n_pad = (-(-n // align)) * align
    if n_pad != n:
        flat = jnp.concatenate([flat, jnp.zeros((n_pad - n,), flat.dtype)])
    return flat.reshape(n_pad // cols, cols), n


def _pick_tile_rows(rows, cols, itemsize):
    # biggest sublane-aligned tile up to ~4 MiB per block
    cap = max(_SUBLANES, (_TARGET_BLOCK_BYTES // (cols * itemsize)) // _SUBLANES * _SUBLANES)
    tile = min(rows, cap)
    # prefer >= 2 grid steps so dimension_semantics=("parallel",) can shard
    # the grid across both TensorCores on v7x
    if tile == rows and rows >= 2 * _SUBLANES:
        tile = max(_SUBLANES, (rows // 2) // _SUBLANES * _SUBLANES)
    return tile


def _scale_pallas(x2d, scale):
    rows, cols = x2d.shape
    tile_rows = _pick_tile_rows(rows, cols, x2d.dtype.itemsize)
    grid = (pl.cdiv(rows, tile_rows),)
    return pl.pallas_call(
        partial(_scale_kernel, scale=scale),
        out_shape=jax.ShapeDtypeStruct((rows, cols), x2d.dtype),
        grid_spec=pltpu.PrefetchScalarGridSpec(
            num_scalar_prefetch=0,
            grid=grid,
            in_specs=[pl.BlockSpec((tile_rows, cols), lambda i: (i, 0))],
            out_specs=pl.BlockSpec((tile_rows, cols), lambda i: (i, 0)),
        ),
        # gradient buffer is dead after this call -> let the output reuse it
        input_output_aliases={0: 0},
        compiler_params=pltpu.CompilerParams(
            dimension_semantics=("parallel",),
            vmem_limit_bytes=32 * 1024 * 1024,
        ),
    )(x2d)


def _neg_scale(g, coeff):
    g2d, n = _to_padded_2d(g)
    out2d = _scale_pallas(g2d, -coeff)
    return out2d.reshape(-1)[:n].reshape(g.shape)


@partial(jax.custom_vjp, nondiff_argnums=(1,))
def gradient_reverse_layer(x, coeff=1.0):
    """Forward: identity (== x * 1.0). Backward: grad -> -coeff * grad."""
    return x


def _grl_fwd(x, coeff):
    # pure identity: no HBM traffic beyond what the surrounding graph already does
    return x, None


def _grl_bwd(coeff, _, g):
    # coeff is a static Python number (nondiff_argnums); dynamic coeff would need
    # an SMEM scalar instead of baking it into the kernel.
    return (_neg_scale(g, float(coeff)),)


gradient_reverse_layer.defvjp(_grl_fwd, _grl_bwd)


if __name__ == "__main__":
    key = jax.random.PRNGKey(0)

    # NCHW input, consistent with the PyTorch module's usage
    x = jax.random.normal(key, (2, 4, 16, 16), dtype=jnp.float32)

    # forward must be exact identity
    y = jax.block_until_ready(gradient_reverse_layer(x, 1.0))
    assert y.shape == x.shape and y.dtype == x.dtype
    assert bool(jnp.all(y == x))

    # backward semantics: d/dx sum(GRL(x)) == -coeff * ones  (runs the Pallas kernel)
    coeff = 0.5
    g = jax.grad(lambda a: jnp.sum(gradient_reverse_layer(a, coeff)))(x)
    g = jax.block_until_ready(g)
    assert bool(jnp.allclose(g, -coeff * jnp.ones_like(x)))

    # non-128-aligned tensor exercises the pad-to-(8,128) fallback path
    x_odd = jax.random.normal(jax.random.PRNGKey(1), (3, 5, 7), dtype=jnp.float32)
    g_odd = jax.grad(lambda a: jnp.sum(gradient_reverse_layer(a, 2.0)))(x_odd)
    g_odd = jax.block_until_ready(g_odd)
    assert g_odd.shape == x_odd.shape
    assert bool(jnp.allclose(g_odd, -2.0 * jnp.ones_like(x_odd)))

    print("KERNEL_OK")
</pallas_src>

<mosaic_0001>
module attributes {stable_mosaic.version = 11 : i64} {
  func.func @_scale_kernel(%arg0: i32, %arg1: memref<8x256xf32, #tpu.memory_space<vmem>>, %arg2: memref<8x256xf32, #tpu.memory_space<vmem>>) attributes {dimension_semantics = [#tpu.dimension_semantics<parallel>], iteration_bounds = array<i64: 1>, scalar_prefetch = 0 : i64, scratch_operands = 0 : i64, tpu.core_type = #tpu.core_type<tc>, window_params = [{transform_indices = @transform_0, window_bounds = array<i64: 8, 256>}, {transform_indices = @transform_1, window_bounds = array<i64: 8, 256>}]} {
    %c0 = arith.constant 0 : index
    %c0_0 = arith.constant 0 : index
    %0 = vector.load %arg1[%c0, %c0_0] : memref<8x256xf32, #tpu.memory_space<vmem>>, vector<8x256xf32>
    %cst = arith.constant -5.000000e-01 : f32
    %1 = vector.broadcast %cst : f32 to vector<8x256xf32>
    %2 = arith.mulf %0, %1 : vector<8x256xf32>
    %c0_1 = arith.constant 0 : index
    %c0_2 = arith.constant 0 : index
    %3 = vector.load %arg2[%c0_1, %c0_2] : memref<8x256xf32, #tpu.memory_space<vmem>>, vector<8x256xf32>
    tpu.vector_store %arg2[%c0_1, %c0_2], %2 {strides = array<i32>} : memref<8x256xf32, #tpu.memory_space<vmem>>, vector<8x256xf32>,
    return
  }
  func.func @transform_0(%arg0: i32) -> (i32, i32) {
    %c0_i32 = arith.constant 0 : i32
    %c0_i32_0 = arith.constant 0 : i32
    return %arg0, %c0_i32 : i32, i32
  }
  func.func @transform_1(%arg0: i32) -> (i32, i32) {
    %c0_i32 = arith.constant 0 : i32
    %c0_i32_0 = arith.constant 0 : i32
    return %arg0, %c0_i32 : i32, i32
  }
}

</mosaic_0001>

<bundles_post_ra>
// kernel: tpu_custom_call.1
= control target key start
LH: loop header
LB: loop body
LE: loop exit
PB: predicated region body
PF: predicated region fallthrough
CT: control target
= control target key end

     0   :  { %6 = vsyncpa [#allocation3], 0  ;;  %s106_s0 = inlined_call_operand.hbm [shape: f32[8,256], index: 0, kind: input, shape index: {}, may-alias: {0,1}]   ;;  %s107_s1 = inlined_call_operand.hbm [shape: f32[8,256], index: 1, kind: output, shape index: {}, may-alias: {0,1}]  }
   0x1   :  { %7 = vsyncpa [#allocation4], 0  ;;  %s88_s6 = smov [#allocation2]  }
   0x2   :  { %s14_s7 = sshll.u32 %s88_s6, 4  ;;  %s15_s7 = int_to_ptr.vmem [resolvable:$true] %s14_s7 }
   0x3   :  { %s52_s8 = scalar_lea.vmem %s15_s7, 256  ;;  %p57_p1 = scmp.lt.s32.totalorder %s15_s7, %s15_s7 }
   0x4   :  { %p53_p0 = scmp.ne.s32.totalorder %s15_s7, %s52_s8  ;;  %p58_p2 = scmp.lt.s32.totalorder %s52_s8, %s52_s8 }
   0x6   :  { %p59_p3 = por %p58_p2, %p57_p1 }
   0x8   :  { %p60_p4 = pnand %p59_p3, %p53_p0 }
   0xa   :  { %63 = shalt.err (!%p60_p4)
}
   0xb   :  { %17 = dma.hbm_to_vmem [thread:$0]  %s106_s0, 256, %s15_s7, [#allocation3]  }
   0xc   :  { %84 = dma.done.wait [#allocation3], 256  }
   0xd   :  { %85 = vsyncadd [#allocation3], 4294967040  ;;  %s89_s11 = smov [#allocation5]   ;;  %v21_v0 = vld [vmem:[#allocation2] sm:$0xff]  ;;  %v22_v1 = vld [vmem:[#allocation2 + $0x8] sm:$0xff] }
   0xe   :  { %s33_s12 = sshll.u32 %s89_s11, 4  ;;  %v23_v2 = vmul.f32 -0.5, %v21_v0  ;;  %v24_v3 = vmul.f32 -0.5, %v22_v1  ;;  %s34_s12 = int_to_ptr.vmem [resolvable:$true] %s33_s12 }
   0xf   :  { %s64_s13 = scalar_lea.vmem %s34_s12, 256  ;;  %p69_p6 = scmp.lt.s32.totalorder %s34_s12, %s34_s12 }
  0x10   :  { %25 = vst [vmem:[#allocation5] sm:$0xff] %v23_v2  ;;  %26 = vst [vmem:[#allocation5 + $0x8] sm:$0xff] %v24_v3  ;;  %p65_p5 = scmp.ne.s32.totalorder %s34_s12, %s64_s13  ;;  %p70_p7 = scmp.lt.s32.totalorder %s64_s13, %s64_s13 }
  0x12   :  { %p71_p8 = por %p70_p7, %p69_p6 }
  0x14   :  { %p72_p9 = pnand %p71_p8, %p65_p5 }
  0x16   :  { %75 = shalt.err (!%p72_p9)
}
  0x17   :  { %36 = dma.vmem_to_hbm [thread:$0]  %s34_s12, 256, %s107_s1, [#allocation4]  }
  0x18   :  { %86 = dma.done.wait [#allocation4], 256  }
  0x19   :  { %87 = vsyncadd [#allocation4], 4294967040 }
  0x1a   :  { %40 = vsyncpa [#allocation3], 1 }
  0x1b   :  { %41 = vsyncpa [#allocation4], 1 }

</bundles_post_ra>
